<compile_context>
chip_gen: v7x
topology: tpu7x:2x2x1
jax: 0.10.0
libtpu: 0.0.40
codegen_flags: <defaults>
</compile_context>

<pallas_src>
import jax
import jax.numpy as jnp
from jax.experimental import pallas as pl
from jax.experimental.pallas import tpu as pltpu


def _round_up(x, m):
    return (x + m - 1) // m * m


def _pick_k_tile(k_padded, tk_max):
    """Largest multiple of 128 <= tk_max that evenly divides k_padded.

    K (contraction dim) must be covered exactly by tiles: out-of-bounds reads
    along K would corrupt the reduction (unlike clipped M/N output writes).
    """
    t = min(tk_max, k_padded)
    t = (t // 128) * 128
    while t > 128 and k_padded % t != 0:
        t -= 128
    return max(t, 128)


# ---------------------------------------------------------------------------
# Kernel bodies
# ---------------------------------------------------------------------------
def _dense_kernel_single(x_ref, w_ref, b_ref, o_ref):
    # Single K block: one MXU pass, bias added in the same epilogue.
    acc = jnp.dot(x_ref[...], w_ref[...], preferred_element_type=jnp.float32)
    o_ref[...] = (acc + b_ref[...].astype(jnp.float32)).astype(o_ref.dtype)


def _dense_kernel_multi_f32out(x_ref, w_ref, b_ref, o_ref):
    # Multi-K, f32 output: accumulate directly into the resident output block
    # (its index_map ignores k), bias folded into the k==0 init.
    k = pl.program_id(2)

    @pl.when(k == 0)
    def _():
        o_ref[...] = jnp.broadcast_to(b_ref[...].astype(o_ref.dtype), o_ref.shape)

    o_ref[...] += jnp.dot(x_ref[...], w_ref[...], preferred_element_type=jnp.float32)


def _dense_kernel_multi_acc(x_ref, w_ref, b_ref, o_ref, acc_ref):
    # Multi-K, narrow output dtype: keep an f32 VMEM accumulator.
    k = pl.program_id(2)

    @pl.when(k == 0)
    def _():
        acc_ref[...] = jnp.broadcast_to(
            b_ref[...].astype(jnp.float32), acc_ref.shape)

    acc_ref[...] += jnp.dot(x_ref[...], w_ref[...],
                            preferred_element_type=jnp.float32)

    @pl.when(k == pl.num_programs(2) - 1)
    def _():
        o_ref[...] = acc_ref[...].astype(o_ref.dtype)


# ---------------------------------------------------------------------------
# Wrapper
# ---------------------------------------------------------------------------
def dense_forward(x, weight, bias, *, compute_dtype=None,
                  tm_max=512, tn_max=512, tk_max=2048):
    """y = x @ weight.T + bias, reshaped to (B, D_out, 1, 1).

    x: (B, D_in); weight: (D_out, D_in) (PyTorch nn.Linear layout);
    bias: (D_out,).  compute_dtype: optional MXU input dtype (e.g. bfloat16);
    accumulation is always f32 and the output keeps x.dtype.
    """
    B, d_in = x.shape
    d_out, d_in_w = weight.shape
    assert d_in == d_in_w and bias.shape == (d_out,)

    out_dtype = x.dtype
    cdt = jnp.dtype(compute_dtype) if compute_dtype is not None else jnp.dtype(x.dtype)

    # One-time transpose to (D_in, D_out) so the kernel uses a standard
    # K-major RHS contraction (no per-tile W re-layout before the MXU).
    x_c = x.astype(cdt)
    w_t = weight.T.astype(cdt)

    # ---- tile sizes -------------------------------------------------------
    sub_q = 8 if cdt.itemsize >= 4 else (16 if cdt.itemsize == 2 else 32)
    tm = min(_round_up(tm_max, sub_q), _round_up(B, sub_q))
    tn = min(tn_max, _round_up(d_out, 128))

    k_pad = _round_up(d_in, 128)
    tk = _pick_k_tile(k_pad, tk_max)

    m_blocks = pl.cdiv(B, tm)
    # v7x megacore: with a single M block, keep >= 2 parallel N blocks so the
    # second TensorCore has work (v5e/v6e are single-TC; harmless there).
    if m_blocks == 1 and pl.cdiv(d_out, tn) < 2 and pl.cdiv(d_out, 128) >= 2:
        tn = _round_up(pl.cdiv(d_out, 2), 128)
    n_blocks = pl.cdiv(d_out, tn)
    k_blocks = k_pad // tk

    # ---- operands: pad only K (zeros contribute nothing to the dot) -------
    if k_pad != d_in:
        x_c = jnp.pad(x_c, ((0, 0), (0, k_pad - d_in)))
        w_t = jnp.pad(w_t, ((0, k_pad - d_in), (0, 0)))
    b2 = bias.reshape(1, d_out)

    # ---- VMEM budget / cost hints -----------------------------------------
    use_acc_scratch = k_blocks > 1 and jnp.dtype(out_dtype) != jnp.dtype(jnp.float32)
    x_bytes = tm * tk * cdt.itemsize
    w_bytes = tk * tn * cdt.itemsize
    o_bytes = tm * tn * jnp.dtype(out_dtype).itemsize
    needed = (2 * (x_bytes + w_bytes + o_bytes)
              + (tm * tn * 4 if use_acc_scratch else 0)
              + 2 * tn * jnp.dtype(bias.dtype).itemsize)
    vmem_limit = int(min(48 * 1024 * 1024, max(2 * needed, 16 * 1024 * 1024)))

    cost = pl.CostEstimate(
        flops=2 * B * d_out * k_pad,
        transcendentals=0,
        bytes_accessed=int(n_blocks * B * k_pad * cdt.itemsize        # x per N block
                           + m_blocks * k_pad * d_out * cdt.itemsize  # W per M block
                           + B * d_out * jnp.dtype(out_dtype).itemsize
                           + d_out * jnp.dtype(bias.dtype).itemsize),
    )

    # ---- grid / specs ------------------------------------------------------
    if k_blocks == 1:
        grid = (m_blocks, n_blocks)
        in_specs = [
            pl.BlockSpec((tm, tk), lambda i, j: (i, 0)),   # x tile
            pl.BlockSpec((tk, tn), lambda i, j: (0, j)),   # W^T tile (K, N)
            pl.BlockSpec((1, tn), lambda i, j: (0, j)),    # bias tile
        ]
        out_specs = pl.BlockSpec((tm, tn), lambda i, j: (i, j))
        kernel = _dense_kernel_single
        scratch = []
        dims = ("parallel", "parallel")
    else:
        grid = (m_blocks, n_blocks, k_blocks)
        in_specs = [
            pl.BlockSpec((tm, tk), lambda i, j, k: (i, k)),
            pl.BlockSpec((tk, tn), lambda i, j, k: (k, j)),
            pl.BlockSpec((1, tn), lambda i, j, k: (0, j)),
        ]
        out_specs = pl.BlockSpec((tm, tn), lambda i, j, k: (i, j))
        if use_acc_scratch:
            kernel = _dense_kernel_multi_acc
            scratch = [pltpu.VMEM((tm, tn), jnp.float32)]
        else:
            kernel = _dense_kernel_multi_f32out
            scratch = []
        dims = ("parallel", "parallel", "arbitrary")

    y = pl.pallas_call(
        kernel,
        out_shape=jax.ShapeDtypeStruct((B, d_out), out_dtype),
        grid_spec=pltpu.PrefetchScalarGridSpec(
            num_scalar_prefetch=0,
            grid=grid,
            in_specs=in_specs,
            out_specs=out_specs,
            scratch_shapes=scratch,
        ),
        compiler_params=pltpu.CompilerParams(
            dimension_semantics=dims,
            vmem_limit_bytes=vmem_limit,
        ),
        cost_estimate=cost,
    )(x_c, w_t, b2)

    # Reshape to feature maps: (B, D_out, 1, 1) -- metadata-only.
    return y[..., None, None]


if __name__ == "__main__":
    key = jax.random.PRNGKey(0)
    kx, kw, kb = jax.random.split(key, 3)

    batch = 2
    input_dim = 32
    output_dim = 64

    x = jax.random.normal(kx, (batch, input_dim), dtype=jnp.float32)
    # PyTorch Linear shapes: W (out, in), b (out,)
    weight = jax.random.normal(kw, (output_dim, input_dim), dtype=jnp.float32) * 0.02
    bias = jax.random.normal(kb, (output_dim,), dtype=jnp.float32) * 0.01

    ref = (x @ weight.T + bias)[..., None, None]

    # f32 path (exact semantics of the PyTorch module)
    out = dense_forward(x, weight, bias)
    jax.block_until_ready(out)
    assert out.shape == (batch, output_dim, 1, 1)
    assert jnp.allclose(out, ref, atol=1e-5, rtol=1e-5)

    # bf16 MXU-input path (f32 accumulation, f32 output) -- looser tolerance
    out_bf16 = dense_forward(x, weight, bias, compute_dtype=jnp.bfloat16)
    jax.block_until_ready(out_bf16)
    assert out_bf16.shape == (batch, output_dim, 1, 1)
    assert jnp.allclose(out_bf16, ref, atol=2e-2, rtol=2e-2)

    print("KERNEL_OK")
</pallas_src>

<mosaic_0001>
module attributes {stable_mosaic.version = 11 : i64} {
  func.func @_dense_kernel_single(%arg0: i32, %arg1: i32, %arg2: memref<8x128xf32, #tpu.memory_space<vmem>>, %arg3: memref<128x128xf32, #tpu.memory_space<vmem>>, %arg4: memref<1x128xf32, #tpu.memory_space<vmem>>, %arg5: memref<8x128xf32, #tpu.memory_space<vmem>>) attributes {dimension_semantics = [#tpu.dimension_semantics<parallel>, #tpu.dimension_semantics<parallel>], iteration_bounds = array<i64: 1, 1>, scalar_prefetch = 0 : i64, scratch_operands = 0 : i64, tpu.core_type = #tpu.core_type<tc>, window_params = [{transform_indices = @transform_0, window_bounds = array<i64: 8, 128>}, {transform_indices = @transform_1, window_bounds = array<i64: 128, 128>}, {transform_indices = @transform_2, window_bounds = array<i64: 1, 128>}, {transform_indices = @transform_3, window_bounds = array<i64: 8, 128>}]} {
    %c0 = arith.constant 0 : index
    %c0_0 = arith.constant 0 : index
    %0 = vector.load %arg2[%c0, %c0_0] : memref<8x128xf32, #tpu.memory_space<vmem>>, vector<8x128xf32>
    %c0_1 = arith.constant 0 : index
    %c0_2 = arith.constant 0 : index
    %1 = vector.load %arg3[%c0_1, %c0_2] : memref<128x128xf32, #tpu.memory_space<vmem>>, vector<128x128xf32>
    %cst = arith.constant dense<0.000000e+00> : vector<8x128xf32>
    %2 = tpu.matmul %0, %1, %cst {dimension_numbers = #tpu.dot_dimension_numbers<[1], [0], [0], [1], [0, 0, 1, 1], [], []>} : vector<8x128xf32>, vector<128x128xf32>, vector<8x128xf32> -> vector<8x128xf32>
    %c0_3 = arith.constant 0 : index
    %c0_4 = arith.constant 0 : index
    %3 = vector.load %arg4[%c0_3, %c0_4] : memref<1x128xf32, #tpu.memory_space<vmem>>, vector<1x128xf32>
    %4 = vector.broadcast %3 : vector<1x128xf32> to vector<8x128xf32>
    %5 = arith.addf %2, %4 : vector<8x128xf32>
    %c0_5 = arith.constant 0 : index
    %c0_6 = arith.constant 0 : index
    %6 = vector.load %arg5[%c0_5, %c0_6] : memref<8x128xf32, #tpu.memory_space<vmem>>, vector<8x128xf32>
    tpu.vector_store %arg5[%c0_5, %c0_6], %5 {strides = array<i32>} : memref<8x128xf32, #tpu.memory_space<vmem>>, vector<8x128xf32>,
    return
  }
  func.func @transform_0(%arg0: i32, %arg1: i32) -> (i32, i32) {
    %c0_i32 = arith.constant 0 : i32
    %c0_i32_0 = arith.constant 0 : i32
    return %arg0, %c0_i32 : i32, i32
  }
  func.func @transform_1(%arg0: i32, %arg1: i32) -> (i32, i32) {
    %c0_i32 = arith.constant 0 : i32
    %c0_i32_0 = arith.constant 0 : i32
    return %c0_i32, %arg1 : i32, i32
  }
  func.func @transform_2(%arg0: i32, %arg1: i32) -> (i32, i32) {
    %c0_i32 = arith.constant 0 : i32
    %c0_i32_0 = arith.constant 0 : i32
    return %c0_i32, %arg1 : i32, i32
  }
  func.func @transform_3(%arg0: i32, %arg1: i32) -> (i32, i32) {
    %c0_i32 = arith.constant 0 : i32
    return %arg0, %arg1 : i32, i32
  }
}

</mosaic_0001>

<bundles_post_ra>
// kernel: tpu_custom_call.1
= control target key start
LH: loop header
LB: loop body
LE: loop exit
PB: predicated region body
PF: predicated region fallthrough
CT: control target
= control target key end

     0   :  { %8 = vsyncpa [#allocation3], 0  ;;  %v233_v2 = vmov 0.0|0.0   ;;  %vm234_vm0 = vmmov 0   ;;  %v235_v6 = vmov 0.0   ;;  %s325_s0 = inlined_call_operand.vmem [shape: f32[2,128], index: 0, kind: input, shape index: {}]   ;;  %s326_s1 = inlined_call_operand.vmem [shape: f32[128,64], index: 1, kind: input, shape index: {}]   ;;  %s327_s2 = inlined_call_operand.vmem [shape: f32[1,64], index: 2, kind: input, shape index: {}]   ;;  %s328_s3 = inlined_call_operand.hbm [shape: f32[2,64], index: 3, kind: output, shape index: {}]  }
   0x1   :  { %v16_v0 = vld [vmem:[%s326_s1] sm:$0xff]  ;;  %v17_v1 = vld [vmem:[%s326_s1 + $0x8] sm:$0xff]  ;;  %179 = vmatprep.subr.bf16.mxu0 %v233_v2  ;;  %v18_v4 = vld [vmem:[%s326_s1 + $0x10] sm:$0xff]  ;;  %176 = vmatprep.mubr.msk.f32.mxu0 %vm234_vm0, %v235_v6 }
   0x2   :  { %v180_v3 = vpack.c.bf16 %v17_v1, %v16_v0  ;;  %v19_v5 = vld [vmem:[%s326_s1 + $0x18] sm:$0xff]  ;;  %v20_v8 = vld [vmem:[%s326_s1 + $0x20] sm:$0xff]  ;;  %v21_v9 = vld [vmem:[%s326_s1 + $0x28] sm:$0xff] }
   0x3   :  { %v183_v7 = vpack.c.bf16 %v19_v5, %v18_v4  ;;  %v186_v10 = vpack.c.bf16 %v21_v9, %v20_v8  ;;  %v22_v11 = vld [vmem:[%s326_s1 + $0x30] sm:$0xff]  ;;  %v23_v12 = vld [vmem:[%s326_s1 + $0x38] sm:$0xff]  ;;  %v24_v14 = vld [vmem:[%s326_s1 + $0x40] sm:$0xff] }
   0x4   :  { %181 = vmatpush3.bf16.msra.mxu0 %v180_v3  ;;  %v189_v13 = vpack.c.bf16 %v23_v12, %v22_v11  ;;  %v25_v15 = vld [vmem:[%s326_s1 + $0x48] sm:$0xff]  ;;  %v26_v17 = vld [vmem:[%s326_s1 + $0x50] sm:$0xff]  ;;  %v27_v18 = vld [vmem:[%s326_s1 + $0x58] sm:$0xff] }
   0x5   :  { %182 = vmatprep.subr.bf16.mxu0 %v233_v2  ;;  %v192_v16 = vpack.c.bf16 %v25_v15, %v24_v14  ;;  %v195_v19 = vpack.c.bf16 %v27_v18, %v26_v17  ;;  %v28_v20 = vld [vmem:[%s326_s1 + $0x60] sm:$0xff]  ;;  %v29_v21 = vld [vmem:[%s326_s1 + $0x68] sm:$0xff]  ;;  %v30_v23 = vld [vmem:[%s326_s1 + $0x70] sm:$0xff] }
   0x6   :  { %v198_v22 = vpack.c.bf16 %v29_v21, %v28_v20  ;;  %v31_v24 = vld [vmem:[%s326_s1 + $0x78] sm:$0xff]  ;;  %v15_v26 = vld [vmem:[%s325_s0] sm:$0xff] }
   0x7   :  { %v201_v25 = vpack.c.bf16 %v31_v24, %v30_v23  ;;  %v126_v27 = vld [vmem:[%s327_s2] ss:$0 sm:$0xff] }
   0x8   :  { %184 = vmatpush3.bf16.msra.mxu0 %v183_v7 }
   0x9   :  { %185 = vmatprep.subr.bf16.mxu0 %v233_v2 }
   0xc   :  { %187 = vmatpush3.bf16.msra.mxu0 %v186_v10 }
   0xd   :  { %188 = vmatprep.subr.bf16.mxu0 %v233_v2 }
  0x10   :  { %190 = vmatpush3.bf16.msra.mxu0 %v189_v13 }
  0x11   :  { %191 = vmatprep.subr.bf16.mxu0 %v233_v2 }
  0x14   :  { %193 = vmatpush3.bf16.msra.mxu0 %v192_v16 }
  0x15   :  { %194 = vmatprep.subr.bf16.mxu0 %v233_v2 }
  0x18   :  { %196 = vmatpush3.bf16.msra.mxu0 %v195_v19 }
  0x19   :  { %197 = vmatprep.subr.bf16.mxu0 %v233_v2 }
  0x1c   :  { %199 = vmatpush3.bf16.msra.mxu0 %v198_v22 }
  0x1d   :  { %200 = vmatprep.subr.bf16.mxu0 %v233_v2 }
  0x20   :  { %202 = vmatpush3.bf16.msra.mxu0 %v201_v25 }
  0x23   :  { %177 = vmatmul.mubr.f32.vlgmr.msra.gmra.mrb[0].mxu0 %v15_v26 }
  0xf6   :  { %v105_v28 = vpop.f32.mrb[0].mxu0 }
  0xf7   :  { %v106_v29 = vadd.f32 %v126_v27, %v105_v28  ;;  %v178_v30 = vpop.f32.mrb[1].mxu0 }
  0xf9   :  { %109 = vst [vmem:[#allocation2] sm:$0xff] %v106_v29 }
  0xfa   :  { %114 = vsyncadd [#allocation3], 96  ;;  %s236_s21 = smov [#allocation2]  }
  0xfb   :  { %s115_s1 = sshll.u32 %s236_s21, 4  ;;  %s116_s1 = int_to_ptr.vmem [resolvable:$true] %s115_s1 }
  0xfc   :  { %s209_s22 = scalar_lea.vmem %s116_s1, 32  ;;  %s213_s23 = scalar_lea.vmem %s116_s1, 128 }
  0xfd   :  { %p210_p0 = scmp.ne.s32.totalorder %s116_s1, %s209_s22  ;;  %p214_p1 = scmp.lt.s32.totalorder %s116_s1, %s116_s1 }
  0xfe   :  { %p215_p2 = scmp.lt.s32.totalorder %s213_s23, %s209_s22 }
 0x100   :  { %p216_p3 = por %p215_p2, %p214_p1 }
 0x102   :  { %p217_p4 = pnand %p216_p3, %p210_p0 }
 0x104   :  { %220 = shalt.err (!%p217_p4)
}
 0x105   :  { %s221_s2 = scalar_lea.hbm %s328_s3, 32 }
 0x106   :  { %p222_p5 = scmp.ne.s32.totalorder %s328_s3, %s221_s2  ;;  %p225_p6 = scmp.lt.u32.totalorder %s221_s2, %s328_s3 }
 0x108   :  { %p227_p7 = pnand %p225_p6, %p222_p5 }
 0x10a   :  { %230 = shalt.err (!%p227_p7)
}
 0x10b   :  { %s237_s29 = smov 32   ;;  %s238_s30 = smov 2  }
 0x10c   :  { %121 = dma.vmem_to_hbm [thread:$0]  %s116_s1, 32, %s328_s3, [#allocation3], %s237_s29, %s237_s29, %s238_s30  }
 0x10d   :  { %231 = dma.done.wait [#allocation3], 128  }
 0x10e   :  { %232 = vsyncadd [#allocation3], 4294967168 }
 0x10f   :  { %125 = vsyncpa [#allocation3], 1 }

</bundles_post_ra>
